<compile_context>
chip_gen: v7x
topology: tpu7x:2x2x1
jax: 0.10.0
libtpu: 0.0.40
codegen_flags: <defaults>
</compile_context>

<pallas_src>
import math

import jax
import jax.numpy as jnp
from jax.experimental import pallas as pl
from jax.experimental.pallas import tpu as pltpu

_LANE = 128
_MAX_WIDTH = 4096               # lanes per slab row (multiple of 128)
_TARGET_TILE_BYTES = 2 * 1024 * 1024   # ~2 MiB per block -> 4 buffers = 8 MiB


def _copy_kernel(x_ref, o_ref):
    # Identity copy of the current (tr, width) tile.
    o_ref[...] = x_ref[...]


def _sublane_pack(dtype):
    """Rows per packed vreg sublane group for this dtype."""
    itemsize = jnp.dtype(dtype).itemsize
    if itemsize >= 4:
        return 8
    if itemsize == 2:
        return 16
    return 32


def _choose_slab(total):
    """Pick (rows, width) with width a multiple of 128 that divides total."""
    cand = (_MAX_WIDTH // _LANE) * _LANE
    while cand >= _LANE:
        if total % cand == 0:
            return total // cand, cand
        cand -= _LANE
    return None


def _row_tile(rows, width, dtype):
    """Dtype-aware row-tile size targeting ~_TARGET_TILE_BYTES per block."""
    pack = _sublane_pack(dtype)
    itemsize = jnp.dtype(dtype).itemsize
    tr = max(pack, _TARGET_TILE_BYTES // (width * itemsize))
    tr = max((tr // pack) * pack, pack)   # keep a sublane-pack multiple
    tr = min(tr, rows)                    # tr == rows (full dim) is also legal
    if rows < pack:
        tr = rows
    return tr


def pallas_view(x, target_shape, *, materialize=True):
    """Equivalent of torch `x.view(x.shape[0], *target_shape)`.

    x            : jnp.ndarray of any rank >= 1
    target_shape : tuple of ints (may contain a single -1, like torch.view)
    materialize  : if False, skip the copy kernel entirely (view is
                   metadata-only, so this is the zero-HBM-traffic fast path).
    """
    b = x.shape[0]
    feat = math.prod(x.shape[1:]) if x.ndim > 1 else 1

    # Resolve a possible -1 in the target shape (torch.view semantics).
    tshape = list(target_shape)
    if -1 in tshape:
        known = math.prod(d for d in tshape if d != -1)
        tshape[tshape.index(-1)] = feat // known
    assert math.prod(tshape) == feat, (
        f"cannot view {x.shape} as ({b}, {tuple(target_shape)})")

    total = b * feat
    slab = None if total == 0 else _choose_slab(total)

    if not materialize or slab is None:
        # Metadata-only reshape (the semantically exact, zero-cost path).
        return x.reshape(b, *tshape)

    rows, width = slab
    x2 = x.reshape(rows, width)          # metadata-only, lane-dense slab
    tr = _row_tile(rows, width, x.dtype)
    grid = (pl.cdiv(rows, tr),)

    out2 = pl.pallas_call(
        _copy_kernel,
        out_shape=jax.ShapeDtypeStruct((rows, width), x2.dtype),
        grid_spec=pltpu.PrefetchScalarGridSpec(
            num_scalar_prefetch=0,
            grid=grid,
            in_specs=[pl.BlockSpec((tr, width), lambda i: (i, 0))],
            out_specs=pl.BlockSpec((tr, width), lambda i: (i, 0)),
        ),
        compiler_params=pltpu.CompilerParams(
            # 'parallel' lets v7x shard the row tiles across its 2 TCs.
            dimension_semantics=("parallel",)),
    )(x2)

    # Final reshape to (batch, *target_shape) — metadata only.
    return out2.reshape(b, *tshape)


class ViewPallas:
    """Mirror of the PyTorch View module (no parameters)."""

    def __init__(self, shape):
        self.shape = tuple(shape)

    def __call__(self, x):
        return pallas_view(x, self.shape)


if __name__ == "__main__":
    key = jax.random.PRNGKey(0)
    # Small NCHW-like input consistent with the module's usage.
    x = jax.random.normal(key, (2, 4, 16, 16), dtype=jnp.float32)

    # Flatten each example: View((-1,)) -> (2, 1024)
    mod = ViewPallas((-1,))
    y = jax.block_until_ready(mod(x))
    ref = x.reshape(x.shape[0], -1)
    assert y.shape == (2, 4 * 16 * 16), y.shape
    assert y.dtype == x.dtype
    assert bool(jnp.array_equal(y, ref))

    # Multi-dim target shape: View((16, 64)) -> (2, 16, 64)
    mod2 = ViewPallas((16, 64))
    y2 = jax.block_until_ready(mod2(x))
    assert y2.shape == (2, 16, 64)
    assert bool(jnp.array_equal(y2, x.reshape(2, 16, 64)))

    # bf16 input exercising the dtype-aware sublane tiling on a bigger slab.
    xb = jax.random.normal(key, (4, 8, 64, 64), dtype=jnp.bfloat16)
    yb = jax.block_until_ready(ViewPallas((-1,))(xb))
    assert yb.shape == (4, 8 * 64 * 64)
    assert yb.dtype == xb.dtype
    assert bool(jnp.array_equal(yb, xb.reshape(4, -1)))

    # Metadata-only fast path (no kernel) must agree as well.
    yz = jax.block_until_ready(pallas_view(x, (-1,), materialize=False))
    assert bool(jnp.array_equal(yz, ref))

    print("KERNEL_OK")
</pallas_src>

<mosaic_0001>
module attributes {stable_mosaic.version = 11 : i64} {
  func.func @_copy_kernel(%arg0: i32, %arg1: memref<1x2048xf32, #tpu.memory_space<vmem>>, %arg2: memref<1x2048xf32, #tpu.memory_space<vmem>>) attributes {dimension_semantics = [#tpu.dimension_semantics<parallel>], iteration_bounds = array<i64: 1>, scalar_prefetch = 0 : i64, scratch_operands = 0 : i64, tpu.core_type = #tpu.core_type<tc>, window_params = [{transform_indices = @transform_0, window_bounds = array<i64: 1, 2048>}, {transform_indices = @transform_1, window_bounds = array<i64: 1, 2048>}]} {
    %c0 = arith.constant 0 : index
    %c0_0 = arith.constant 0 : index
    %0 = vector.load %arg1[%c0, %c0_0] : memref<1x2048xf32, #tpu.memory_space<vmem>>, vector<1x2048xf32>
    %c0_1 = arith.constant 0 : index
    %c0_2 = arith.constant 0 : index
    %1 = vector.load %arg2[%c0_1, %c0_2] : memref<1x2048xf32, #tpu.memory_space<vmem>>, vector<1x2048xf32>
    tpu.vector_store %arg2[%c0_1, %c0_2], %0 {strides = array<i32>} : memref<1x2048xf32, #tpu.memory_space<vmem>>, vector<1x2048xf32>,
    return
  }
  func.func @transform_0(%arg0: i32) -> (i32, i32) {
    %c0_i32 = arith.constant 0 : i32
    %c0_i32_0 = arith.constant 0 : i32
    return %arg0, %c0_i32 : i32, i32
  }
  func.func @transform_1(%arg0: i32) -> (i32, i32) {
    %c0_i32 = arith.constant 0 : i32
    %c0_i32_0 = arith.constant 0 : i32
    return %arg0, %c0_i32 : i32, i32
  }
}

</mosaic_0001>

<bundles_post_ra>
// kernel: tpu_custom_call.1
= control target key start
LH: loop header
LB: loop body
LE: loop exit
PB: predicated region body
PF: predicated region fallthrough
CT: control target
= control target key end

     0   :  { %6 = vsyncpa [#allocation3], 0  ;;  %s126_s0 = inlined_call_operand.hbm [shape: f32[1,2048], index: 0, kind: input, shape index: {}]   ;;  %s127_s1 = inlined_call_operand.hbm [shape: f32[1,2048], index: 1, kind: output, shape index: {}]  }
   0x1   :  { %7 = vsyncpa [#allocation4], 0  ;;  %s90_s6 = smov [#allocation2]   ;;  %s42_s10 = scalar_lea.hbm %s126_s0, 256 }
   0x2   :  { %s14_s7 = sshll.u32 %s90_s6, 4  ;;  %p43_p0 = scmp.ne.s32.totalorder %s126_s0, %s42_s10  ;;  %s15_s7 = int_to_ptr.vmem [resolvable:$true] %s14_s7 }
   0x3   :  { %p46_p1 = scmp.lt.u32.totalorder %s42_s10, %s126_s0 }
   0x5   :  { %p48_p2 = pnand %p46_p1, %p43_p0 }
   0x7   :  { %51 = shalt.err (!%p48_p2)
}
   0x8   :  { %s52_s15 = scalar_lea.vmem %s15_s7, 256  ;;  %p57_p4 = scmp.lt.s32.totalorder %s15_s7, %s15_s7 }
   0x9   :  { %p53_p3 = scmp.ne.s32.totalorder %s15_s7, %s52_s15  ;;  %p58_p5 = scmp.lt.s32.totalorder %s52_s15, %s52_s15 }
   0xb   :  { %p59_p6 = por %p58_p5, %p57_p4 }
   0xd   :  { %p60_p7 = pnand %p59_p6, %p53_p3 }
   0xf   :  { %63 = shalt.err (!%p60_p7)
}
  0x10   :  { %17 = dma.hbm_to_vmem [thread:$0]  %s126_s0, 256, %s15_s7, [#allocation3]  }
  0x11   :  { %86 = dma.done.wait [#allocation3], 256  }
  0x12   :  { %87 = vsyncadd [#allocation3], 4294967040  ;;  %s91_s18 = smov [#allocation5]   ;;  %v21_v0 = vld [vmem:[#allocation2] sm:$0xff]  ;;  %v22_v1 = vld [vmem:[#allocation2 + $0x8] sm:$0xff] }
  0x13   :  { %s31_s19 = sshll.u32 %s91_s18, 4  ;;  %23 = vst [vmem:[#allocation5] sm:$0xff] %v21_v0  ;;  %24 = vst [vmem:[#allocation5 + $0x8] sm:$0xff] %v22_v1  ;;  %s32_s19 = int_to_ptr.vmem [resolvable:$true] %s31_s19 }
  0x14   :  { %s64_s20 = scalar_lea.vmem %s32_s19, 256  ;;  %p69_p9 = scmp.lt.s32.totalorder %s32_s19, %s32_s19 }
  0x15   :  { %p65_p8 = scmp.ne.s32.totalorder %s32_s19, %s64_s20  ;;  %p70_p10 = scmp.lt.s32.totalorder %s64_s20, %s64_s20 }
  0x17   :  { %p71_p11 = por %p70_p10, %p69_p9 }
  0x19   :  { %p72_p12 = pnand %p71_p11, %p65_p8 }
  0x1b   :  { %75 = shalt.err (!%p72_p12)
}
  0x1c   :  { %s76_s0 = scalar_lea.hbm %s127_s1, 256 }
  0x1d   :  { %p77_p13 = scmp.ne.s32.totalorder %s127_s1, %s76_s0  ;;  %p80_p0 = scmp.lt.u32.totalorder %s76_s0, %s127_s1 }
  0x1f   :  { %p82_p1 = pnand %p80_p0, %p77_p13 }
  0x21   :  { %85 = shalt.err (!%p82_p1)
}
  0x22   :  { %34 = dma.vmem_to_hbm [thread:$0]  %s32_s19, 256, %s127_s1, [#allocation4]  }
  0x23   :  { %88 = dma.done.wait [#allocation4], 256  }
  0x24   :  { %89 = vsyncadd [#allocation4], 4294967040 }
  0x25   :  { %38 = vsyncpa [#allocation3], 1 }
  0x26   :  { %39 = vsyncpa [#allocation4], 1 }

</bundles_post_ra>
